<compile_context>
chip_gen: v7x
topology: tpu7x:2x2x1
jax: 0.10.0
libtpu: 0.0.40
codegen_flags: <defaults>
</compile_context>

<pallas_src>
import jax
import jax.numpy as jnp
from jax.experimental import pallas as pl
from jax.experimental.pallas import tpu as pltpu


def _round_up(v, m):
    return (v + m - 1) // m * m


def _block_kernel(x_ref, w1_ref, b1_ref, w2_ref, b2_ref, o_ref, h_ref):
    """One batch tile, lane-dense (feature, batch) layout.

    x_ref : (in_N,  TILE_B)   streamed batch tile (batch on the lane axis)
    w1_ref: (width, in_N)     VMEM-resident
    b1_ref: (width, 1)        VMEM-resident (f32)
    w2_ref: (out_N, width)    VMEM-resident
    b2_ref: (out_N, 1)        VMEM-resident (f32)
    o_ref : (out_N, TILE_B)   output tile
    h_ref : (width, TILE_B)   VMEM scratch for the hidden activation
                              (f32, or bf16 on bf16-EUP chips)
    """
    # L1: h = tanh(W1 @ x + b1) -> (width, TILE_B). f32 MXU accumulation and
    # f32 bias-add; the tanh runs in the hidden dtype (bf16 EUP on v6e/v7x,
    # f32 on v5e), and the scratch store is in that dtype too (halves vst/vld
    # traffic when bf16).
    h_pre = (
        jnp.dot(w1_ref[...], x_ref[...], preferred_element_type=jnp.float32)
        + b1_ref[...]
    )
    h_ref[...] = jnp.tanh(h_pre.astype(h_ref.dtype))

    # L2: y = tanh(W2 @ h + b2) -> (out_N, TILE_B). h is already in the weight
    # (operand) dtype, so no reload cast; accumulation stays f32.
    y_pre = (
        jnp.dot(w2_ref[...], h_ref[...], preferred_element_type=jnp.float32)
        + b2_ref[...]
    )
    o_ref[...] = jnp.tanh(y_pre).astype(o_ref.dtype)


def deep_ritz_block(
    x,
    w1,
    b1,
    w2,
    b2,
    *,
    tile_b=8192,
    compute_dtype=None,
    hidden_dtype=None,
    transposed_output=False,
):
    """Fused forward of the Deep Ritz Block: tanh(tanh(x @ W1^T + b1) @ W2^T + b2).

    x : (B, in_N)
    w1: (width, in_N), b1: (width,)     -- PyTorch nn.Linear layout
    w2: (out_N, width), b2: (out_N,)
    Returns (B, out_N) in x's original dtype, or (out_N, B_padded-free) i.e.
    (out_N, B) if transposed_output=True (skips the final transpose).

    tile_b: batch tile size (multiple of 128). Default 8192; sweep 8K-64K for
            large production batches. The effective tile is clamped to the
            128-rounded batch size. On v7x keep B/tile_b >= 2 so both
            TensorCores get work; on v5e keep the f32 h footprint
            (width*4*tile_b bytes) inside the ~16 MiB scoped VMEM or rely on
            the automatic vmem_limit_bytes bump below.
    compute_dtype: optional (e.g. jnp.bfloat16) cast of MXU operands (x, W1, W2)
            for v6e/v7x; accumulation stays f32.
    hidden_dtype: dtype of the hidden activation h (scratch + L1 tanh). Defaults
            to compute_dtype if set, else f32. On v5e pass jnp.float32 explicitly
            even with compute_dtype=bf16 (no bf16 VPU/EUP there).
    """
    if tile_b % 128 != 0:
        raise ValueError("tile_b must be a multiple of 128 (lane width)")

    B, in_N = x.shape
    width = w1.shape[0]
    out_N = w2.shape[0]
    out_dtype = x.dtype

    if compute_dtype is not None:
        x = x.astype(compute_dtype)
        w1 = w1.astype(compute_dtype)
        w2 = w2.astype(compute_dtype)
    op_dtype = x.dtype
    if hidden_dtype is None:
        hidden_dtype = compute_dtype if compute_dtype is not None else jnp.float32

    # Clamp the tile to the (128-rounded) batch so small batches use one snug
    # tile instead of a mostly-padded giant one.
    tile_eff = min(tile_b, _round_up(B, 128))
    n_tiles = pl.cdiv(B, tile_eff)
    b_pad = n_tiles * tile_eff

    # Lane-dense layout: batch on the last (lane) axis, padded with zeros via a
    # single padded transpose (no zeros + dynamic-update-slice). Padded columns
    # compute tanh(b1)-derived values that are sliced off below.
    x_t = x.T
    if b_pad != B:
        x_t = jnp.pad(x_t, ((0, 0), (0, b_pad - B)))

    # Biases kept 2-D (features on sublane, broadcast along lanes), f32.
    b1c = b1.reshape(width, 1).astype(jnp.float32)
    b2c = b2.reshape(out_N, 1).astype(jnp.float32)

    # VMEM footprint estimate (sublane-padded), used to raise the scoped limit
    # when sweeping very large tiles.
    op_bytes = jnp.dtype(op_dtype).itemsize
    h_bytes = jnp.dtype(hidden_dtype).itemsize
    est_vmem = (
        2 * _round_up(in_N, 8) * tile_eff * op_bytes      # x, double-buffered
        + 2 * _round_up(out_N, 8) * tile_eff * jnp.dtype(out_dtype).itemsize
        + _round_up(width, 8) * tile_eff * h_bytes        # h scratch
        + 2 * _round_up(width, 8) * 128 * op_bytes        # weights + biases (tiny)
    )
    compiler_kwargs = dict(dimension_semantics=("parallel",))
    if est_vmem > 24 * 1024 * 1024:
        compiler_kwargs["vmem_limit_bytes"] = int(est_vmem + 8 * 1024 * 1024)

    y_t = pl.pallas_call(
        _block_kernel,
        out_shape=jax.ShapeDtypeStruct((out_N, b_pad), out_dtype),
        grid_spec=pltpu.PrefetchScalarGridSpec(
            num_scalar_prefetch=0,
            grid=(n_tiles,),
            in_specs=[
                pl.BlockSpec((in_N, tile_eff), lambda i: (0, i)),  # x tile (pipelined)
                pl.BlockSpec((width, in_N), lambda i: (0, 0)),     # W1 (resident)
                pl.BlockSpec((width, 1), lambda i: (0, 0)),        # b1 (resident)
                pl.BlockSpec((out_N, width), lambda i: (0, 0)),    # W2 (resident)
                pl.BlockSpec((out_N, 1), lambda i: (0, 0)),        # b2 (resident)
            ],
            out_specs=pl.BlockSpec((out_N, tile_eff), lambda i: (0, i)),
            scratch_shapes=[pltpu.VMEM((width, tile_eff), hidden_dtype)],
        ),
        compiler_params=pltpu.CompilerParams(**compiler_kwargs),
    )(x_t, w1, b1c, w2, b2c)

    y_t = y_t[:, :B]
    if transposed_output:
        return y_t                 # (out_N, B) — skips the output transpose
    return y_t.T                   # (B, out_N)

    # TODO(synk): optional sublane packing (view (4,B) x/y as (8,B/2) with
    # block-diagonal weights) would halve streamed HBM bytes on v5e; omitted
    # for clarity since the streaming side is already far from the roofline on
    # v6e/v7x.


def _init_linear(key, fan_in, fan_out, dtype=jnp.float32):
    # PyTorch nn.Linear default init: U(-1/sqrt(fan_in), 1/sqrt(fan_in)).
    # Weight stored in PyTorch layout (fan_out, fan_in), bias (fan_out,).
    kw, kb = jax.random.split(key)
    bound = 1.0 / jnp.sqrt(jnp.asarray(fan_in, dtype))
    w = jax.random.uniform(kw, (fan_out, fan_in), dtype, -bound, bound)
    b = jax.random.uniform(kb, (fan_out,), dtype, -bound, bound)
    return w, b


if __name__ == "__main__":
    key = jax.random.PRNGKey(0)
    kx, k1, k2 = jax.random.split(key, 3)

    # Small but non-trivial shapes: batch not a multiple of 128 to exercise the
    # padding path; features match the Deep-Ritz Block (4 -> 32 -> 4).
    batch, in_N, width, out_N = 300, 4, 32, 4

    x = jax.random.normal(kx, (batch, in_N), jnp.float32)
    w1, b1 = _init_linear(k1, in_N, width)
    w2, b2 = _init_linear(k2, width, out_N)

    # Default (f32) path — exact numerics vs the reference.
    y = deep_ritz_block(x, w1, b1, w2, b2)
    y = jax.block_until_ready(y)

    # Pure-JAX reference (same math as the PyTorch module).
    ref = jnp.tanh(jnp.tanh(x @ w1.T + b1) @ w2.T + b2)
    assert y.shape == (batch, out_N)
    assert jnp.allclose(y, ref, atol=1e-5, rtol=1e-5)

    # bf16 operand/hidden path (v6e/v7x production config) — looser tolerance.
    y_bf16 = deep_ritz_block(
        x, w1, b1, w2, b2, compute_dtype=jnp.bfloat16, hidden_dtype=jnp.bfloat16
    )
    y_bf16 = jax.block_until_ready(y_bf16)
    assert y_bf16.shape == (batch, out_N)
    assert jnp.allclose(y_bf16.astype(jnp.float32), ref, atol=3e-2, rtol=3e-2)

    print("KERNEL_OK")
</pallas_src>

<mosaic_0001>
module attributes {stable_mosaic.version = 11 : i64} {
  func.func @_block_kernel(%arg0: i32, %arg1: memref<4x384xf32, #tpu.memory_space<vmem>>, %arg2: memref<32x4xf32, #tpu.memory_space<vmem>>, %arg3: memref<32x1xf32, #tpu.memory_space<vmem>>, %arg4: memref<4x32xf32, #tpu.memory_space<vmem>>, %arg5: memref<4x1xf32, #tpu.memory_space<vmem>>, %arg6: memref<4x384xf32, #tpu.memory_space<vmem>>, %arg7: memref<32x384xf32, #tpu.memory_space<vmem>>) attributes {dimension_semantics = [#tpu.dimension_semantics<parallel>], iteration_bounds = array<i64: 1>, scalar_prefetch = 0 : i64, scratch_operands = 1 : i64, tpu.core_type = #tpu.core_type<tc>, window_params = [{transform_indices = @transform_0, window_bounds = array<i64: 4, 384>}, {pipeline_mode = #tpu.pipeline_mode<synchronous>, transform_indices = @transform_1, window_bounds = array<i64: 32, 4>}, {pipeline_mode = #tpu.pipeline_mode<synchronous>, transform_indices = @transform_2, window_bounds = array<i64: 32, 1>}, {pipeline_mode = #tpu.pipeline_mode<synchronous>, transform_indices = @transform_3, window_bounds = array<i64: 4, 32>}, {pipeline_mode = #tpu.pipeline_mode<synchronous>, transform_indices = @transform_4, window_bounds = array<i64: 4, 1>}, {transform_indices = @transform_5, window_bounds = array<i64: 4, 384>}]} {
    %c0 = arith.constant 0 : index
    %c0_0 = arith.constant 0 : index
    %0 = vector.load %arg2[%c0, %c0_0] : memref<32x4xf32, #tpu.memory_space<vmem>>, vector<32x4xf32>
    %c0_1 = arith.constant 0 : index
    %c0_2 = arith.constant 0 : index
    %1 = vector.load %arg1[%c0_1, %c0_2] : memref<4x384xf32, #tpu.memory_space<vmem>>, vector<4x384xf32>
    %cst = arith.constant dense<0.000000e+00> : vector<32x384xf32>
    %2 = tpu.matmul %0, %1, %cst {dimension_numbers = #tpu.dot_dimension_numbers<[1], [0], [0], [1], [0, 0, 1, 1], [], []>} : vector<32x4xf32>, vector<4x384xf32>, vector<32x384xf32> -> vector<32x384xf32>
    %c0_3 = arith.constant 0 : index
    %c0_4 = arith.constant 0 : index
    %3 = vector.load %arg3[%c0_3, %c0_4] : memref<32x1xf32, #tpu.memory_space<vmem>>, vector<32x1xf32>
    %4 = vector.broadcast %3 : vector<32x1xf32> to vector<32x384xf32>
    %5 = arith.addf %2, %4 : vector<32x384xf32>
    %6 = math.tanh %5 : vector<32x384xf32>
    %c0_5 = arith.constant 0 : index
    %c0_6 = arith.constant 0 : index
    %7 = vector.load %arg7[%c0_5, %c0_6] : memref<32x384xf32, #tpu.memory_space<vmem>>, vector<32x384xf32>
    tpu.vector_store %arg7[%c0_5, %c0_6], %6 {strides = array<i32>} : memref<32x384xf32, #tpu.memory_space<vmem>>, vector<32x384xf32>,
    %c0_7 = arith.constant 0 : index
    %c0_8 = arith.constant 0 : index
    %8 = vector.load %arg4[%c0_7, %c0_8] : memref<4x32xf32, #tpu.memory_space<vmem>>, vector<4x32xf32>
    %c0_9 = arith.constant 0 : index
    %c0_10 = arith.constant 0 : index
    %9 = vector.load %arg7[%c0_9, %c0_10] : memref<32x384xf32, #tpu.memory_space<vmem>>, vector<32x384xf32>
    %cst_11 = arith.constant dense<0.000000e+00> : vector<4x384xf32>
    %10 = tpu.matmul %8, %9, %cst_11 {dimension_numbers = #tpu.dot_dimension_numbers<[1], [0], [0], [1], [0, 0, 1, 1], [], []>} : vector<4x32xf32>, vector<32x384xf32>, vector<4x384xf32> -> vector<4x384xf32>
    %c0_12 = arith.constant 0 : index
    %c0_13 = arith.constant 0 : index
    %11 = vector.load %arg5[%c0_12, %c0_13] : memref<4x1xf32, #tpu.memory_space<vmem>>, vector<4x1xf32>
    %12 = vector.broadcast %11 : vector<4x1xf32> to vector<4x384xf32>
    %13 = arith.addf %10, %12 : vector<4x384xf32>
    %14 = math.tanh %13 : vector<4x384xf32>
    %c0_14 = arith.constant 0 : index
    %c0_15 = arith.constant 0 : index
    %15 = vector.load %arg6[%c0_14, %c0_15] : memref<4x384xf32, #tpu.memory_space<vmem>>, vector<4x384xf32>
    tpu.vector_store %arg6[%c0_14, %c0_15], %14 {strides = array<i32>} : memref<4x384xf32, #tpu.memory_space<vmem>>, vector<4x384xf32>,
    return
  }
  func.func @transform_0(%arg0: i32) -> (i32, i32) {
    %c0_i32 = arith.constant 0 : i32
    %c0_i32_0 = arith.constant 0 : i32
    return %c0_i32, %arg0 : i32, i32
  }
  func.func @transform_1(%arg0: i32) -> (i32, i32) {
    %c0_i32 = arith.constant 0 : i32
    %c0_i32_0 = arith.constant 0 : i32
    %c0_i32_1 = arith.constant 0 : i32
    return %c0_i32, %c0_i32_0 : i32, i32
  }
  func.func @transform_2(%arg0: i32) -> (i32, i32) {
    %c0_i32 = arith.constant 0 : i32
    %c0_i32_0 = arith.constant 0 : i32
    %c0_i32_1 = arith.constant 0 : i32
    return %c0_i32, %c0_i32_0 : i32, i32
  }
  func.func @transform_3(%arg0: i32) -> (i32, i32) {
    %c0_i32 = arith.constant 0 : i32
    %c0_i32_0 = arith.constant 0 : i32
    %c0_i32_1 = arith.constant 0 : i32
    return %c0_i32, %c0_i32_0 : i32, i32
  }
  func.func @transform_4(%arg0: i32) -> (i32, i32) {
    %c0_i32 = arith.constant 0 : i32
    %c0_i32_0 = arith.constant 0 : i32
    %c0_i32_1 = arith.constant 0 : i32
    return %c0_i32, %c0_i32_0 : i32, i32
  }
  func.func @transform_5(%arg0: i32) -> (i32, i32) {
    %c0_i32 = arith.constant 0 : i32
    %c0_i32_0 = arith.constant 0 : i32
    return %c0_i32, %arg0 : i32, i32
  }
}

</mosaic_0001>

<bundles_post_ra>
// kernel: tpu_custom_call.1
= control target key start
LH: loop header
LB: loop body
LE: loop exit
PB: predicated region body
PF: predicated region fallthrough
CT: control target
= control target key end

     0   :  { %vm67_vm0 = vcmask 1043456   ;;  %v579_v2 = vmov 0.0   ;;  %vm54_vm1 = vcmask 31744   ;;  %v580_v5 = vmov 0   ;;  %s676_s0 = inlined_call_operand.vmem [shape: f32[4,384], index: 0, kind: input, shape index: {}]   ;;  %s677_s1 = inlined_call_operand.vmem [shape: f32[32,4], index: 1, kind: input, shape index: {}]   ;;  %s678_s2 = inlined_call_operand.vmem [shape: f32[32,1], index: 2, kind: input, shape index: {}]   ;;  %s679_s3 = inlined_call_operand.vmem [shape: f32[4,32], index: 3, kind: input, shape index: {}]   ;;  %s680_s4 = inlined_call_operand.vmem [shape: f32[4,1], index: 4, kind: input, shape index: {}]   ;;  %s681_s5 = inlined_call_operand.hbm [shape: f32[4,384], index: 5, kind: output, shape index: {}]  }
   0x1   :  { %v25_v0 = vld [vmem:[%s676_s0] sm:$0xff]  ;;  %138 = vmatprep.mubr.f32.mxu0 %v579_v2  ;;  %156 = vmatprep.mubr.f32.mxu1 %v579_v2  ;;  %v24_v4 = vld [vmem:[%s677_s1 + $0x18] sm:$0xff]  ;;  %v26_v6 = vld [vmem:[%s676_s0 + $0x8] sm:$0xf] }
   0x2   :  { %v53_v1 = vcombine.high %v25_v0, %v25_v0  ;;  %v21_v3 = vld [vmem:[%s677_s1] sm:$0xff]  ;;  %522 = vset.pattern.permute.xlu0 %v580_v5  ;;  %523 = vset.pattern.permute.xlu1 %v580_v5 }
   0x4   :  { %459 = vmatprep.subr.msk.mxu0 %vm67_vm0, %v53_v1  ;;  %515 = vmatprep.subr.msk.mxu1 %vm67_vm0, %v53_v1 }
   0x5   :  { %10 = vsyncpa [#allocation4], 0  ;;  %460 = vmatpush1.msk.msra.mxu0 %vm67_vm0, %v25_v0  ;;  %516 = vmatpush1.msk.msra.mxu1 %vm67_vm0, %v25_v0  ;;  %v27_v7 = vld [vmem:[%s678_s2] sm:$0xff]  ;;  %v29_v8 = vld [vmem:[%s678_s2 + $0x10] sm:$0xff]  ;;  %v581_v14 = vmov 0.0|0.0   ;;  %vm582_vm2 = vmmov 0  }
   0x6   :  { %461 = vmatmul.mubr.msk.f32.vlgmr.msra.gmra.mrb[0].mxu0 %vm54_vm1, %v21_v3  ;;  %464 = vmatmul.mubr.msk.f32.vlgmr.msra.gmra.mrb[0].mxu1 %vm54_vm1, %v24_v4  ;;  %v22_v9 = vld [vmem:[%s677_s1 + $0x8] sm:$0xff]  ;;  %v23_v10 = vld [vmem:[%s677_s1 + $0x10] sm:$0xff]  ;;  %v30_v12 = vld [vmem:[%s678_s2 + $0x18] sm:$0xff]  ;;  %vm291_vm3 = vcmask 261120   ;;  %s583_s13 = smov [#allocation3]  }
   0x7   :  { %482 = vmatprep.subr.msk.mxu1 %vm67_vm0, %v26_v6  ;;  %144 = vmatprep.mubr.f32.mxu0 %v579_v2  ;;  %v28_v11 = vld [vmem:[%s678_s2 + $0x8] sm:$0xff]  ;;  %v285_v13 = vld [vmem:[%s680_s4] sm:$0xf]  ;;  %s451_s14 = sshll.u32 %s583_s13, 4  ;;  %s452_s14 = int_to_ptr.vmem [resolvable:$true] %s451_s14 }
   0x8   :  { %483 = vmatpush3.msk.msra.mxu1 %vm67_vm0, %v26_v6  ;;  %484 = vmatprep.mubr.msk.f32.mxu1 %vm54_vm1, %v21_v3  ;;  %v272_v61 = vld [vmem:[%s679_s3] sm:$0xf]  ;;  %s555_s3 = scalar_lea.vmem %s452_s14, 192  ;;  %p560_p1 = scmp.lt.s32.totalorder %s452_s14, %s452_s14 }
   0x9   :  { %33 = vperm.xlu0 %522, %v27_v7   ;;  %43 = vperm.xlu1 %523, %v29_v8   ;;  %p556_p0 = scmp.ne.s32.totalorder %s452_s14, %s555_s3  ;;  %p561_p2 = scmp.lt.s32.totalorder %s555_s3, %s555_s3 }
   0xa   :  { %462 = vmatmul.mubr.msk.f32.gmra.mrb[2].mxu0 %vm54_vm1, %v22_v9  ;;  %485 = vmatmul.mubr.msk.f32.vlgmr.msra.gmra.mrb[2].mxu1 %vm54_vm1, %v22_v9 }
   0xb   :  { %150 = vmatprep.mubr.f32.mxu0 %v579_v2  ;;  %487 = vmatprep.mubr.msk.f32.mxu1 %vm54_vm1, %v23_v10  ;;  %p562_p3 = por %p561_p2, %p560_p1 }
   0xc   :  { %509 = vmatprep.subr.bf16.mxu0 %v581_v14 }
   0xd   :  { %38 = vperm.xlu0 %522, %v28_v11   ;;  %48 = vperm.xlu1 %523, %v30_v12   ;;  %p563_p4 = pnand %p562_p3, %p556_p0 }
   0xe   :  { %463 = vmatmul.mubr.msk.f32.gmra.mrb[4].mxu0 %vm54_vm1, %v23_v10  ;;  %488 = vmatmul.mubr.msk.f32.gmra.mrb[4].mxu1 %vm54_vm1, %v24_v4 }
   0xf   :  { %359 = vmatprep.mubr.f32.mxu1 %v579_v2  ;;  %498 = vmatprep.mubr.msk.f32.mxu0 %vm582_vm2, %v579_v2 }
  0x11   :  { %288 = vperm.xlu0 %522, %v285_v13  }
  0x88   :  { %v44_v15 = vpop.permute.xlu1 %43  ;;  %v34_v16 = vpop.permute.xlu0 %33 }
  0x8c   :  { %v49_v17 = vpop.permute.xlu1 %48  ;;  %v39_v26 = vpop.permute.xlu0 %38 }
  0x90   :  { %v289_v62 = vpop.permute.xlu0 %288 }
  0xd9   :  { %v140_v18 = vpop.f32.mrb[0].mxu0  ;;  %v158_v19 = vpop.f32.mrb[0].mxu1 }
  0xda   :  { %v141_v20 = vadd.f32 %v140_v18, %v34_v16  ;;  %v159_v21 = vadd.f32 %v158_v19, %v49_v17  ;;  %v142_v22 = vpop.f32.mrb[1].mxu0  ;;  %v160_v23 = vpop.f32.mrb[1].mxu1 }
  0xdb   :  { %v143_v24 = vadd.f32 %v142_v22, %v34_v16  ;;  %v161_v25 = vadd.f32 %v160_v23, %v49_v17 }
  0xdc   :  { %525 = vtanh.f32 %v141_v20 }
  0xdd   :  { %527 = vtanh.f32 %v159_v21  ;;  %v146_v27 = vpop.f32.mrb[2].mxu0  ;;  %v486_v28 = vpop.f32.mrb[2].mxu1 }
  0xde   :  { %529 = vtanh.f32 %v143_v24  ;;  %v147_v29 = vadd.f32 %v146_v27, %v39_v26  ;;  %v235_v30 = vadd.f32 %v486_v28, %v39_v26  ;;  %v148_v31 = vpop.f32.mrb[3].mxu0  ;;  %v229_v32 = vpop.f32.mrb[3].mxu1 }
  0xdf   :  { %531 = vtanh.f32 %v161_v25  ;;  %v149_v33 = vadd.f32 %v148_v31, %v39_v26  ;;  %v230_v34 = vadd.f32 %v229_v32, %v34_v16 }
  0xe0   :  { %533 = vtanh.f32 %v147_v29 }
  0xe1   :  { %535 = vtanh.f32 %v235_v30  ;;  %v152_v35 = vpop.f32.mrb[4].mxu0  ;;  %v489_v36 = vpop.f32.mrb[4].mxu1 }
  0xe2   :  { %537 = vtanh.f32 %v149_v33  ;;  %v153_v37 = vadd.f32 %v152_v35, %v44_v15  ;;  %v245_v38 = vadd.f32 %v489_v36, %v49_v17  ;;  %v154_v39 = vpop.f32.mrb[5].mxu0  ;;  %v239_v40 = vpop.f32.mrb[5].mxu1 }
  0xe3   :  { %539 = vtanh.f32 %v230_v34  ;;  %v155_v41 = vadd.f32 %v154_v39, %v44_v15  ;;  %v240_v42 = vadd.f32 %v239_v40, %v44_v15 }
  0xe4   :  { %541 = vtanh.f32 %v153_v37 }
  0xe5   :  { %543 = vtanh.f32 %v245_v38 }
  0xe6   :  { %v526_v43 = vpop.eup %525  ;;  %545 = vtanh.f32 %v155_v41 }
  0xe7   :  { %v528_v44 = vpop.eup %527  ;;  %547 = vtanh.f32 %v240_v42 }
  0xe8   :  { %v530_v45 = vpop.eup %529 }
  0xe9   :  { %v532_v46 = vpop.eup %531 }
  0xea   :  { %v534_v47 = vpop.eup %533 }
  0xeb   :  { %v536_v48 = vpop.eup %535  ;;  %v503_v49 = vpack.c.bf16 %v534_v47, %v526_v43 }
  0xec   :  { %v538_v50 = vpop.eup %537 }
  0xed   :  { %v540_v51 = vpop.eup %539  ;;  %v501_v52 = vpack.c.bf16 %v538_v50, %v530_v45 }
  0xee   :  { %v542_v53 = vpop.eup %541  ;;  %v510_v54 = vpack.c.bf16 %v536_v48, %v540_v51 }
  0xef   :  { %v544_v55 = vpop.eup %543  ;;  %502 = vmatprep.subr.bf16.mxu1 %v501_v52  ;;  %v507_v56 = vpack.c.bf16 %v528_v44, %v542_v53 }
  0xf0   :  { %v546_v57 = vpop.eup %545  ;;  %511 = vmatpush3.bf16.msra.mxu0 %v510_v54  ;;  %504 = vmatpush1.bf16.msra.mxu1 %v503_v49 }
  0xf1   :  { %v548_v58 = vpop.eup %547  ;;  %512 = vmatprep.subr.bf16.mxu0 %v581_v14  ;;  %v505_v59 = vpack.c.bf16 %v532_v46, %v546_v57 }
  0xf2   :  { %v513_v60 = vpack.c.bf16 %v544_v55, %v548_v58 }
  0xf3   :  { %506 = vmatprep.subr.bf16.mxu1 %v505_v59 }
  0xf4   :  { %514 = vmatpush3.bf16.msra.mxu0 %v513_v60  ;;  %508 = vmatpush1.bf16.msra.mxu1 %v507_v56 }
  0xf7   :  { %499 = vmatmul.mubr.msk.f32.vlgmr.msra.gmra.mrb[6].mxu0 %vm291_vm3, %v272_v61  ;;  %470 = vmatmul.mubr.msk.f32.vlgmr.msra.gmra.mrb[6].mxu1 %vm291_vm3, %v272_v61 }
 0x1ca   :  { %v432_v63 = vpop.f32.mrb[6].mxu0  ;;  %v361_v0 = vpop.f32.mrb[6].mxu1 }
 0x1cb   :  { %v433_v1 = vadd.f32 %v432_v63, %v289_v62  ;;  %v362_v2 = vadd.f32 %v361_v0, %v289_v62  ;;  %v363_v3 = vpop.f32.mrb[7].mxu1  ;;  %v500_v4 = vpop.f32.mrb[7].mxu0 }
 0x1cc   :  { %v364_v5 = vadd.f32 %v363_v3, %v289_v62 }
 0x1cd   :  { %549 = vtanh.f32 %v433_v1 }
 0x1ce   :  { %551 = vtanh.f32 %v362_v2 }
 0x1cf   :  { %553 = vtanh.f32 %v364_v5 }
 0x1d7   :  { %v550_v6 = vpop.eup %549 }
 0x1d8   :  { %v552_v7 = vpop.eup %551  ;;  %444 = vst [vmem:[#allocation3 + $0x8] sm:$0xf] %v550_v6 }
 0x1d9   :  { %v554_v8 = vpop.eup %553 }
 0x1da   :  { %v441_v9 = vcombine.low %v552_v7, %v554_v8 }
 0x1dc   :  { %443 = vst [vmem:[#allocation3] sm:$0xff] %v441_v9 }
 0x1dd   :  { %566 = shalt.err (!%p563_p4)
}
 0x1de   :  { %s567_s17 = scalar_lea.hbm %s681_s5, 192 }
 0x1df   :  { %p568_p5 = scmp.ne.s32.totalorder %s681_s5, %s567_s17  ;;  %p571_p6 = scmp.lt.u32.totalorder %s567_s17, %s681_s5 }
 0x1e1   :  { %p573_p7 = pnand %p571_p6, %p568_p5 }
 0x1e3   :  { %576 = shalt.err (!%p573_p7)
}
 0x1e4   :  { %454 = dma.vmem_to_hbm [thread:$0]  %s452_s14, 192, %s681_s5, [#allocation4]  }
 0x1e5   :  { %577 = dma.done.wait [#allocation4], 192  }
 0x1e6   :  { %578 = vsyncadd [#allocation4], 4294967104 }
 0x1e7   :  { %458 = vsyncpa [#allocation4], 1 }

</bundles_post_ra>
